<compile_context>
chip_gen: v7x
topology: tpu7x:2x2x1
jax: 0.10.0
libtpu: 0.0.40
codegen_flags: <defaults>
</compile_context>

<pallas_src>
import jax
import jax.numpy as jnp
from jax.experimental import pallas as pl
from jax.experimental.pallas import tpu as pltpu


def _idwt_kernel(lo_ref, hi_ref, out_ref):
    """One grid step.

    lo_ref : (1, TC, THW)      low band
    hi_ref : (1, 3, TC, THW)   sub-bands [x2, x3, x4]
    out_ref: (1, 4, TC, THW)   parity planes [ee, eo, oe, oo]
    """
    x1 = lo_ref[0] * 0.5
    x2 = hi_ref[0, 0] * 0.5
    x3 = hi_ref[0, 1] * 0.5
    x4 = hi_ref[0, 2] * 0.5
    # Butterfly: p,q,r,s then 4 combines (8 add/subs total).
    p = x1 + x4
    q = x1 - x4
    r = x2 + x3
    s = x2 - x3
    out_ref[0, 0] = p - r   # rows 0::2, cols 0::2
    out_ref[0, 1] = q + s   # rows 0::2, cols 1::2
    out_ref[0, 2] = q - s   # rows 1::2, cols 0::2
    out_ref[0, 3] = p + r   # rows 1::2, cols 1::2


def _pick_tiles(C, hw, itemsize, target_bytes=1 << 20):
    """Choose (channel_tile, spatial_tile) giving ~target-sized, layout-legal blocks.

    Channel tile must be a multiple of 8 (dense sublanes) dividing C, or C itself.
    Spatial tile must be a multiple of 128 (dense lanes) dividing H*W, or H*W itself.
    """
    chan_opts = [d for d in range(8, C + 1, 8) if C % d == 0] or [C]
    sp_opts = [d for d in range(128, hw, 128) if hw % d == 0] + [hw]

    best = (chan_opts[0], sp_opts[0])
    best_bytes = best[0] * best[1] * itemsize
    for tc in chan_opts:
        for thw in sp_opts:
            b = tc * thw * itemsize
            if b <= target_bytes:
                # Largest tile that still fits the target.
                if best_bytes > target_bytes or b > best_bytes:
                    best, best_bytes = (tc, thw), b
            elif best_bytes > target_bytes and b < best_bytes:
                # Nothing fits: take the smallest available tile.
                best, best_bytes = (tc, thw), b
    return best


def idwt_layers(low, high):
    """Pallas implementation of IDWTLayers.forward(low, high) -> (B, C, 2H, 2W)."""
    B, C, H, W = low.shape
    assert high.shape == (B, 3 * C, H, W), "high must have 3*C channels"
    hw = H * W
    itemsize = jnp.dtype(low.dtype).itemsize

    tc, thw = _pick_tiles(C, hw, itemsize)
    grid = (B, C // tc, hw // thw)

    # Free, contiguous reshapes (no HBM copies): spatial flattened to one
    # lane-dense axis; `high` viewed as its 3 sub-band groups.
    lo = low.reshape(B, C, hw)
    hi = high.reshape(B, 3, C, hw)

    step_bytes = 8 * tc * thw * itemsize          # (1 + 3) input + 4 output planes
    vmem_limit = int(min(100 << 20, max(48 << 20, 4 * step_bytes)))

    raw = pl.pallas_call(
        _idwt_kernel,
        out_shape=jax.ShapeDtypeStruct((B, 4, C, hw), low.dtype),
        grid=grid,
        in_specs=[
            pl.BlockSpec((1, tc, thw), lambda b, c, k: (b, c, k)),
            pl.BlockSpec((1, 3, tc, thw), lambda b, c, k: (b, 0, c, k)),
        ],
        out_specs=pl.BlockSpec((1, 4, tc, thw), lambda b, c, k: (b, 0, c, k)),
        compiler_params=pltpu.CompilerParams(
            dimension_semantics=("parallel", "parallel", "parallel"),
            vmem_limit_bytes=vmem_limit,
        ),
    )(lo, hi)

    # Parity planes -> interleaved NCHW. Under jit this fuses into one copy:
    # final[b, c, 2h+rp, 2w+cp] = raw[b, 2*rp+cp, c, h*W+w].
    out = raw.reshape(B, 2, 2, C, H, W)            # (b, rp, cp, c, h, w)
    out = jnp.transpose(out, (0, 3, 4, 1, 5, 2))   # (b, c, h, rp, w, cp)
    return out.reshape(B, C, 2 * H, 2 * W)


def _idwt_ref(low, high):
    """Pure-JAX reference matching the PyTorch Haar IDWT."""
    B, C, H, W = low.shape
    x1 = low * 0.5
    x2 = high[:, 0:C] * 0.5
    x3 = high[:, C:2 * C] * 0.5
    x4 = high[:, 2 * C:3 * C] * 0.5
    out = jnp.zeros((B, C, 2 * H, 2 * W), low.dtype)
    out = out.at[:, :, 0::2, 0::2].set(x1 - x2 - x3 + x4)
    out = out.at[:, :, 1::2, 0::2].set(x1 - x2 + x3 - x4)
    out = out.at[:, :, 0::2, 1::2].set(x1 + x2 - x3 - x4)
    out = out.at[:, :, 1::2, 1::2].set(x1 + x2 + x3 + x4)
    return out


if __name__ == "__main__":
    key = jax.random.PRNGKey(0)
    k_lo, k_hi = jax.random.split(key)
    B, C, H, W = 2, 4, 16, 16
    low = jax.random.normal(k_lo, (B, C, H, W), dtype=jnp.float32)
    high = jax.random.normal(k_hi, (B, 3 * C, H, W), dtype=jnp.float32)

    idwt = jax.jit(idwt_layers)
    y = jax.block_until_ready(idwt(low, high))
    y_ref = _idwt_ref(low, high)

    assert y.shape == (B, C, 2 * H, 2 * W), y.shape
    assert jnp.allclose(y, y_ref, atol=1e-5, rtol=1e-5), float(
        jnp.max(jnp.abs(y - y_ref)))
    print("KERNEL_OK")
</pallas_src>

<mosaic_0001>
module attributes {stable_mosaic.version = 11 : i64} {
  func.func @_idwt_kernel(%arg0: i32, %arg1: i32, %arg2: i32, %arg3: memref<1x4x256xf32, #tpu.memory_space<vmem>>, %arg4: memref<1x3x4x256xf32, #tpu.memory_space<vmem>>, %arg5: memref<1x4x4x256xf32, #tpu.memory_space<vmem>>) attributes {dimension_semantics = [#tpu.dimension_semantics<parallel>, #tpu.dimension_semantics<parallel>, #tpu.dimension_semantics<parallel>], iteration_bounds = array<i64: 2, 1, 1>, scalar_prefetch = 0 : i64, scratch_operands = 0 : i64, tpu.core_type = #tpu.core_type<tc>, window_params = [{transform_indices = @transform_0, window_bounds = array<i64: 1, 4, 256>}, {transform_indices = @transform_1, window_bounds = array<i64: 1, 3, 4, 256>}, {transform_indices = @transform_2, window_bounds = array<i64: 1, 4, 4, 256>}]} {
    %c0 = arith.constant 0 : index
    %c0_0 = arith.constant 0 : index
    %c0_1 = arith.constant 0 : index
    %0 = vector.load %arg3[%c0, %c0_0, %c0_1] : memref<1x4x256xf32, #tpu.memory_space<vmem>>, vector<1x4x256xf32>
    %1 = vector.shape_cast %0 : vector<1x4x256xf32> to vector<4x256xf32>
    %cst = arith.constant 5.000000e-01 : f32
    %2 = vector.broadcast %cst : f32 to vector<4x256xf32>
    %3 = arith.mulf %1, %2 : vector<4x256xf32>
    %c0_2 = arith.constant 0 : index
    %c0_3 = arith.constant 0 : index
    %c0_4 = arith.constant 0 : index
    %c0_5 = arith.constant 0 : index
    %4 = vector.load %arg4[%c0_2, %c0_3, %c0_4, %c0_5] : memref<1x3x4x256xf32, #tpu.memory_space<vmem>>, vector<1x1x4x256xf32>
    %5 = vector.shape_cast %4 : vector<1x1x4x256xf32> to vector<4x256xf32>
    %cst_6 = arith.constant 5.000000e-01 : f32
    %6 = vector.broadcast %cst_6 : f32 to vector<4x256xf32>
    %7 = arith.mulf %5, %6 : vector<4x256xf32>
    %c0_7 = arith.constant 0 : index
    %c1 = arith.constant 1 : index
    %c0_8 = arith.constant 0 : index
    %c0_9 = arith.constant 0 : index
    %8 = vector.load %arg4[%c0_7, %c1, %c0_8, %c0_9] : memref<1x3x4x256xf32, #tpu.memory_space<vmem>>, vector<1x1x4x256xf32>
    %9 = vector.shape_cast %8 : vector<1x1x4x256xf32> to vector<4x256xf32>
    %cst_10 = arith.constant 5.000000e-01 : f32
    %10 = vector.broadcast %cst_10 : f32 to vector<4x256xf32>
    %11 = arith.mulf %9, %10 : vector<4x256xf32>
    %c0_11 = arith.constant 0 : index
    %c2 = arith.constant 2 : index
    %c0_12 = arith.constant 0 : index
    %c0_13 = arith.constant 0 : index
    %12 = vector.load %arg4[%c0_11, %c2, %c0_12, %c0_13] : memref<1x3x4x256xf32, #tpu.memory_space<vmem>>, vector<1x1x4x256xf32>
    %13 = vector.shape_cast %12 : vector<1x1x4x256xf32> to vector<4x256xf32>
    %cst_14 = arith.constant 5.000000e-01 : f32
    %14 = vector.broadcast %cst_14 : f32 to vector<4x256xf32>
    %15 = arith.mulf %13, %14 : vector<4x256xf32>
    %16 = arith.addf %3, %15 : vector<4x256xf32>
    %17 = arith.subf %3, %15 : vector<4x256xf32>
    %18 = arith.addf %7, %11 : vector<4x256xf32>
    %19 = arith.subf %7, %11 : vector<4x256xf32>
    %20 = arith.subf %16, %18 : vector<4x256xf32>
    %c0_15 = arith.constant 0 : index
    %c0_16 = arith.constant 0 : index
    %c0_17 = arith.constant 0 : index
    %c0_18 = arith.constant 0 : index
    %21 = vector.load %arg5[%c0_15, %c0_16, %c0_17, %c0_18] : memref<1x4x4x256xf32, #tpu.memory_space<vmem>>, vector<1x1x4x256xf32>
    %22 = vector.shape_cast %21 : vector<1x1x4x256xf32> to vector<4x256xf32>
    %23 = vector.shape_cast %20 : vector<4x256xf32> to vector<1x1x4x256xf32>
    tpu.vector_store %arg5[%c0_15, %c0_16, %c0_17, %c0_18], %23 {strides = array<i32>} : memref<1x4x4x256xf32, #tpu.memory_space<vmem>>, vector<1x1x4x256xf32>,
    %24 = arith.addf %17, %19 : vector<4x256xf32>
    %c0_19 = arith.constant 0 : index
    %c1_20 = arith.constant 1 : index
    %c0_21 = arith.constant 0 : index
    %c0_22 = arith.constant 0 : index
    %25 = vector.load %arg5[%c0_19, %c1_20, %c0_21, %c0_22] : memref<1x4x4x256xf32, #tpu.memory_space<vmem>>, vector<1x1x4x256xf32>
    %26 = vector.shape_cast %25 : vector<1x1x4x256xf32> to vector<4x256xf32>
    %27 = vector.shape_cast %24 : vector<4x256xf32> to vector<1x1x4x256xf32>
    tpu.vector_store %arg5[%c0_19, %c1_20, %c0_21, %c0_22], %27 {strides = array<i32>} : memref<1x4x4x256xf32, #tpu.memory_space<vmem>>, vector<1x1x4x256xf32>,
    %28 = arith.subf %17, %19 : vector<4x256xf32>
    %c0_23 = arith.constant 0 : index
    %c2_24 = arith.constant 2 : index
    %c0_25 = arith.constant 0 : index
    %c0_26 = arith.constant 0 : index
    %29 = vector.load %arg5[%c0_23, %c2_24, %c0_25, %c0_26] : memref<1x4x4x256xf32, #tpu.memory_space<vmem>>, vector<1x1x4x256xf32>
    %30 = vector.shape_cast %29 : vector<1x1x4x256xf32> to vector<4x256xf32>
    %31 = vector.shape_cast %28 : vector<4x256xf32> to vector<1x1x4x256xf32>
    tpu.vector_store %arg5[%c0_23, %c2_24, %c0_25, %c0_26], %31 {strides = array<i32>} : memref<1x4x4x256xf32, #tpu.memory_space<vmem>>, vector<1x1x4x256xf32>,
    %32 = arith.addf %16, %18 : vector<4x256xf32>
    %c0_27 = arith.constant 0 : index
    %c3 = arith.constant 3 : index
    %c0_28 = arith.constant 0 : index
    %c0_29 = arith.constant 0 : index
    %33 = vector.load %arg5[%c0_27, %c3, %c0_28, %c0_29] : memref<1x4x4x256xf32, #tpu.memory_space<vmem>>, vector<1x1x4x256xf32>
    %34 = vector.shape_cast %33 : vector<1x1x4x256xf32> to vector<4x256xf32>
    %35 = vector.shape_cast %32 : vector<4x256xf32> to vector<1x1x4x256xf32>
    tpu.vector_store %arg5[%c0_27, %c3, %c0_28, %c0_29], %35 {strides = array<i32>} : memref<1x4x4x256xf32, #tpu.memory_space<vmem>>, vector<1x1x4x256xf32>,
    return
  }
  func.func @transform_0(%arg0: i32, %arg1: i32, %arg2: i32) -> (i32, i32, i32) {
    %c0_i32 = arith.constant 0 : i32
    return %arg0, %arg1, %arg2 : i32, i32, i32
  }
  func.func @transform_1(%arg0: i32, %arg1: i32, %arg2: i32) -> (i32, i32, i32, i32) {
    %c0_i32 = arith.constant 0 : i32
    %c0_i32_0 = arith.constant 0 : i32
    return %arg0, %c0_i32, %arg1, %arg2 : i32, i32, i32, i32
  }
  func.func @transform_2(%arg0: i32, %arg1: i32, %arg2: i32) -> (i32, i32, i32, i32) {
    %c0_i32 = arith.constant 0 : i32
    %c0_i32_0 = arith.constant 0 : i32
    return %arg0, %c0_i32, %arg1, %arg2 : i32, i32, i32, i32
  }
}

</mosaic_0001>

<bundles_post_ra>
// kernel: idwt_layers.1
= control target key start
LH: loop header
LB: loop body
LE: loop exit
PB: predicated region body
PF: predicated region fallthrough
CT: control target
= control target key end

     0   :  { %s508_s9 = smov 0   ;;  %s510_s10 = smov 0   ;;  %s544_s0 = inlined_call_operand.vmem [shape: f32[2,4,256], index: 0, kind: input, shape index: {}]   ;;  %s545_s1 = inlined_call_operand.vmem [shape: f32[2,3,4,256], index: 1, kind: input, shape index: {}]   ;;  %s546_s2 = inlined_call_operand.vmem [shape: f32[2,4,4,256], index: 2, kind: output, shape index: {}]  }
   0x1   :  { %s512_s11 = smov 0  }
   0x2 LB: > { %s31_s12 = sadd.s32 1, %s487_s10  ;;  %p429_p0 = scmp.ge.s32.totalorder %s491_s11, 1  ;;  %s491_s11 = sphi %s512_s11, %s12_s11   ;;  %s487_s10 = sphi %s510_s10, %s548_s10   ;;  %s483_s9 = sphi %s508_s9, %s547_s9  }
   0x3   : > { %p33_p1 = scmp.ge.s32.totalorder %s31_s12, 2  ;;  %p171_p2 = scmp.lt.s32.totalorder %s491_s11, 3 }
   0x5   : > { %s550_s12 = smov (%p33_p1, %s31_s12), 0  ;;  %p172_p3 = pnand %p429_p0, %p171_p2 }
   0x6   : > { %p223_p4 = scmp.lt.s32.totalorder (!%p172_p3), %s483_s9, 1 }
   0x7   : > { %175 = sbr.rel (%p172_p3) target bundleno = 27 (0x1b), region = 28 }
   0xe   : > { %s552_s9 = smov (!%p223_p4, %s483_s9), 1 }
   0xf   : > { %s442_s13 = sshll.u32 %s552_s9, 3  ;;  %s444_s14 = smul.u32 24, %s552_s9 }
  0x10   : > { %s234_s17 = scalar_lea.vmem %s544_s0, %s442_s13  ;;  %s443_s21 = sshll.u32 %s552_s9, 5 }
  0x11   : > { %s248_s20 = scalar_lea.vmem %s545_s1, %s444_s14  ;;  %v264_v0 = vld [vmem:[%s234_s17] sm:$0xff]  ;;  %s262_s24 = scalar_lea.vmem %s546_s2, %s443_s21 }
  0x12   : > { %v265_v1 = vmul.f32 0.5, %v264_v0  ;;  %v266_v2 = vld [vmem:[%s248_s20] sm:$0xff]  ;;  %v435_v3 = vld [vmem:[%s248_s20 + $0x8] sm:$0xff]  ;;  %v436_v4 = vld [vmem:[%s248_s20 + $0x10] sm:$0xff] }
  0x13   : > { %v267_v5 = vmul.f32 0.5, %v266_v2  ;;  %v270_v6 = vmul.f32 0.5, %v435_v3  ;;  %v273_v7 = vmul.f32 0.5, %v436_v4 }
  0x15   : > { %v274_v8 = vadd.f32 %v273_v7, %v265_v1  ;;  %v276_v9 = vadd.f32 %v270_v6, %v267_v5  ;;  %v275_v10 = vsub.f32 %v265_v1, %v273_v7  ;;  %v277_v11 = vsub.f32 %v267_v5, %v270_v6 }
  0x17   : > { %v278_v12 = vsub.f32 %v274_v8, %v276_v9  ;;  %v280_v13 = vadd.f32 %v277_v11, %v275_v10  ;;  %v283_v14 = vsub.f32 %v275_v10, %v277_v11  ;;  %v286_v15 = vadd.f32 %v276_v9, %v274_v8 }
  0x19   : > { %279 = vst [vmem:[%s262_s24] sm:$0xff] %v278_v12  ;;  %437 = vst [vmem:[%s262_s24 + $0x8] sm:$0xff] %v280_v13 }
  0x1a   : > { %438 = vst [vmem:[%s262_s24 + $0x10] sm:$0xff] %v283_v14  ;;  %439 = vst [vmem:[%s262_s24 + $0x18] sm:$0xff] %v286_v15 }
  0x1b PF: > { %s12_s11 = sadd.s32 1, %s491_s11   ;;  %s547_s9 = smov %s487_s10 }
  0x1c   : > { %p9_p5 = scmp.ge.s32.totalorder %s12_s11, 4   ;;  %s548_s10 = smov %s550_s12 }
  0x1e   :  { %11 = sbr.rel (!%p9_p5) target bundleno = 2 (0x2), region = 66 }

</bundles_post_ra>
